<compile_context>
chip_gen: v5e
topology: v5e:2x2
jax: 0.10.0
libtpu: 0.0.40
codegen_flags: <defaults>
</compile_context>

<pallas_src>
import functools

import jax
import jax.numpy as jnp
from jax.experimental import pallas as pl
from jax.experimental.pallas import tpu as pltpu


def _mlp_fwp_kernel(x_ref, w1_ref, b1_ref, w2_ref, b2_ref, w3_ref, b3_ref,
                    out_ref, *, precision):
    x = x_ref[...]
    # w1 carries a zero row for the dropped last state column, so this is
    # exactly state[:, :-1] @ W1.
    h = jnp.dot(x, w1_ref[...], preferred_element_type=jnp.float32,
                precision=precision) + b1_ref[...]
    h = jnp.maximum(h, 0.0)
    h = jnp.dot(h, w2_ref[...], preferred_element_type=jnp.float32,
                precision=precision) + b2_ref[...]
    h = jnp.maximum(h, 0.0)
    out = jnp.dot(h, w3_ref[...], preferred_element_type=jnp.float32,
                  precision=precision) + b3_ref[...]
    out_ref[...] = out.astype(out_ref.dtype)


def _round_up(x, m):
    return (x + m - 1) // m * m


def _choose_batch_tile(batch, batch_tile):
    """Pick the per-grid-step batch tile (always a multiple of 8)."""
    if batch <= 16:
        # Tiny batch: single grid step, bucketed to a multiple of 8 so
        # distinct small batch sizes share a compiled block shape.
        return max(8, _round_up(batch, 8))
    # Keep at least two grid steps so the "parallel" batch axis can be
    # sharded across both v7x TensorCores (no-op on v5e/v6e).
    two_steps = _round_up(pl.cdiv(batch, 2), 8)
    return max(8, min(batch_tile, two_steps))


def gflownet_ising_init_forward(state, params, *, batch_tile=4096,
                                precision=None):
    """Pallas implementation of GFlowNetIsingInit.forward.

    Args:
      state: (B, input_size + 1) float32 array.  The trailing column is the
             one PyTorch drops via state[:, :-1]; here it is neutralized by
             the zero-padded last row of w1.
      params: dict with w1 (in+1, H) [last row zero], b1 (1, H), w2 (H, H),
              b2 (1, H), w3 (H, out), b3 (1, out), log_Z (1,) [unused here].
      batch_tile: max rows per grid step (multiple of 8).
      precision: lax.Precision for the matmuls (None = default MXU path,
                 HIGHEST for bit-faithful f32).

    Returns:
      (fwp_logits of shape (B, output_size), ones of shape (B, 1))
    """
    B, in_dim_p1 = state.shape
    H = params["w1"].shape[1]
    out_dim = params["w3"].shape[1]
    assert params["w1"].shape[0] == in_dim_p1, "w1 must be zero-row padded"
    assert batch_tile % 8 == 0 and batch_tile >= 8

    tb = _choose_batch_tile(B, batch_tile)
    grid = (pl.cdiv(B, tb),)

    x_spec = pl.BlockSpec((tb, in_dim_p1), lambda i: (i, 0))
    out_spec = pl.BlockSpec((tb, out_dim), lambda i: (i, 0))
    # Constant index_map => fetched once, resident in VMEM for all grid steps.
    const_spec = lambda shape: pl.BlockSpec(shape, lambda i: (0, 0))

    # VMEM budget (f32, sublane-padded to 8 / lane-padded to 128), with the
    # x / out blocks double-buffered by the pipeline.  Re-derived per call so
    # raising batch_tile or hidden_size stays within v7x's 64 MiB VMEM.
    def _padded_bytes(r, c):
        return _round_up(r, 8) * _round_up(c, 128) * 4

    vmem_needed = (2 * _padded_bytes(tb, in_dim_p1)
                   + 2 * _padded_bytes(tb, out_dim)
                   + 2 * (_padded_bytes(in_dim_p1, H) + _padded_bytes(1, H)
                          + _padded_bytes(H, H) + _padded_bytes(1, H)
                          + _padded_bytes(H, out_dim)
                          + _padded_bytes(1, out_dim)))
    assert vmem_needed <= 48 * 1024 * 1024, (
        "batch_tile/hidden_size too large for VMEM; shrink batch_tile")
    vmem_limit = min(48 * 1024 * 1024,
                     max(32 * 1024 * 1024, 2 * vmem_needed))

    flops = 2 * B * (in_dim_p1 * H + H * H + H * out_dim)
    bytes_accessed = 4 * (B * in_dim_p1 + in_dim_p1 * H + H + H * H + H
                          + H * out_dim + out_dim + B * out_dim)

    out = pl.pallas_call(
        functools.partial(_mlp_fwp_kernel, precision=precision),
        out_shape=jax.ShapeDtypeStruct((B, out_dim), jnp.float32),
        grid=grid,
        in_specs=[
            x_spec,
            const_spec((in_dim_p1, H)), const_spec((1, H)),
            const_spec((H, H)), const_spec((1, H)),
            const_spec((H, out_dim)), const_spec((1, out_dim)),
        ],
        out_specs=out_spec,
        compiler_params=pltpu.CompilerParams(
            dimension_semantics=("parallel",),
            vmem_limit_bytes=vmem_limit),
        cost_estimate=pl.CostEstimate(
            flops=flops, transcendentals=0, bytes_accessed=bytes_accessed),
    )(state, params["w1"], params["b1"], params["w2"], params["b2"],
      params["w3"], params["b3"])

    # The constant second output of the PyTorch module is produced here in
    # the wrapper (compile-time constant), not in the kernel, where it used
    # to cost a 1/128-lane-dense masked-store output pipeline per grid step.
    ones = jnp.ones((B, 1), dtype=out.dtype)
    return out, ones


def init_params(key, input_size, hidden_size, output_size):
    """Deterministic PyTorch-style (uniform +-1/sqrt(fan_in)) init.

    w1 is stored zero-row padded to (input_size + 1, hidden_size) so the
    kernel can consume the raw state (with its extra trailing column)
    directly.
    """
    ks = jax.random.split(key, 6)

    def linear(kw, kb, fan_in, fan_out):
        bound = 1.0 / jnp.sqrt(jnp.float32(fan_in))
        w = jax.random.uniform(kw, (fan_in, fan_out), jnp.float32, -bound, bound)
        b = jax.random.uniform(kb, (1, fan_out), jnp.float32, -bound, bound)
        return w, b

    w1, b1 = linear(ks[0], ks[1], input_size, hidden_size)
    w1_padded = jnp.concatenate(
        [w1, jnp.zeros((1, hidden_size), jnp.float32)], axis=0)
    w2, b2 = linear(ks[2], ks[3], hidden_size, hidden_size)
    w3, b3 = linear(ks[4], ks[5], hidden_size, output_size)
    return {
        "w1": w1_padded, "b1": b1,
        "w2": w2, "b2": b2,
        "w3": w3, "b3": b3,
        "log_Z": jnp.zeros((1,), jnp.float32),  # unused in forward (as in torch)
    }


def _reference(state, params):
    x = state[:, :-1]
    w1 = params["w1"][:-1]  # drop the zero padding row
    h = jnp.maximum(x @ w1 + params["b1"], 0.0)
    h = jnp.maximum(h @ params["w2"] + params["b2"], 0.0)
    return h @ params["w3"] + params["b3"]


if __name__ == "__main__":
    # initial_lattice of shape (4, 4) -> input_size = output_size = 16
    L1, L2 = 4, 4
    input_size = L1 * L2
    output_size = L1 * L2
    hidden_size = 32

    key = jax.random.PRNGKey(0)
    k_param, k_state1, k_state2, k_state3 = jax.random.split(key, 4)
    params = init_params(k_param, input_size, hidden_size, output_size)

    fwd = jax.jit(gflownet_ising_init_forward,
                  static_argnames=("batch_tile", "precision"))

    # --- case 1: tiny batch, single grid step --------------------------------
    batch = 8
    state = jax.random.normal(k_state1, (batch, input_size + 1), jnp.float32)
    fwp_logits, ones = fwd(state, params)
    jax.block_until_ready((fwp_logits, ones))

    ref = _reference(state, params)
    assert fwp_logits.shape == (batch, output_size)
    assert ones.shape == (batch, 1)
    assert jnp.allclose(fwp_logits, ref, atol=1e-5, rtol=1e-5)
    assert jnp.all(ones == 1.0)

    # --- case 2: B > 16 -> tile auto-capped so grid has >= 2 steps -----------
    batch2 = 48
    state2 = jax.random.normal(k_state2, (batch2, input_size + 1), jnp.float32)
    fwp_logits2, ones2 = fwd(state2, params)          # tb=24 -> grid=(2,)
    jax.block_until_ready((fwp_logits2, ones2))

    ref2 = _reference(state2, params)
    assert fwp_logits2.shape == (batch2, output_size)
    assert ones2.shape == (batch2, 1)
    assert jnp.allclose(fwp_logits2, ref2, atol=1e-5, rtol=1e-5)
    assert jnp.all(ones2 == 1.0)

    # --- case 3: odd batch -> bucketed tile + masked partial final block -----
    batch3 = 20
    state3 = jax.random.normal(k_state3, (batch3, input_size + 1), jnp.float32)
    fwp_logits3, ones3 = fwd(state3, params)          # tb=16 -> grid=(2,)
    jax.block_until_ready((fwp_logits3, ones3))

    ref3 = _reference(state3, params)
    assert fwp_logits3.shape == (batch3, output_size)
    assert ones3.shape == (batch3, 1)
    assert jnp.allclose(fwp_logits3, ref3, atol=1e-5, rtol=1e-5)
    assert jnp.all(ones3 == 1.0)

    print("KERNEL_OK")
</pallas_src>

<mosaic_0001>
module attributes {stable_mosaic.version = 11 : i64} {
  func.func @_mlp_fwp_kernel(%arg0: i32, %arg1: memref<8x17xf32, #tpu.memory_space<vmem>>, %arg2: memref<17x32xf32, #tpu.memory_space<vmem>>, %arg3: memref<1x32xf32, #tpu.memory_space<vmem>>, %arg4: memref<32x32xf32, #tpu.memory_space<vmem>>, %arg5: memref<1x32xf32, #tpu.memory_space<vmem>>, %arg6: memref<32x16xf32, #tpu.memory_space<vmem>>, %arg7: memref<1x16xf32, #tpu.memory_space<vmem>>, %arg8: memref<8x16xf32, #tpu.memory_space<vmem>>) attributes {dimension_semantics = [#tpu.dimension_semantics<parallel>], iteration_bounds = array<i64: 1>, scalar_prefetch = 0 : i64, scratch_operands = 0 : i64, tpu.core_type = #tpu.core_type<tc>, window_params = [{transform_indices = @transform_0, window_bounds = array<i64: 8, 17>}, {pipeline_mode = #tpu.pipeline_mode<synchronous>, transform_indices = @transform_1, window_bounds = array<i64: 17, 32>}, {pipeline_mode = #tpu.pipeline_mode<synchronous>, transform_indices = @transform_2, window_bounds = array<i64: 1, 32>}, {pipeline_mode = #tpu.pipeline_mode<synchronous>, transform_indices = @transform_3, window_bounds = array<i64: 32, 32>}, {pipeline_mode = #tpu.pipeline_mode<synchronous>, transform_indices = @transform_4, window_bounds = array<i64: 1, 32>}, {pipeline_mode = #tpu.pipeline_mode<synchronous>, transform_indices = @transform_5, window_bounds = array<i64: 32, 16>}, {pipeline_mode = #tpu.pipeline_mode<synchronous>, transform_indices = @transform_6, window_bounds = array<i64: 1, 16>}, {transform_indices = @transform_7, window_bounds = array<i64: 8, 16>}]} {
    %c0 = arith.constant 0 : index
    %c0_0 = arith.constant 0 : index
    %0 = vector.load %arg1[%c0, %c0_0] : memref<8x17xf32, #tpu.memory_space<vmem>>, vector<8x17xf32>
    %c0_1 = arith.constant 0 : index
    %c0_2 = arith.constant 0 : index
    %1 = vector.load %arg2[%c0_1, %c0_2] : memref<17x32xf32, #tpu.memory_space<vmem>>, vector<17x32xf32>
    %cst = arith.constant dense<0.000000e+00> : vector<8x32xf32>
    %2 = tpu.matmul %0, %1, %cst {dimension_numbers = #tpu.dot_dimension_numbers<[1], [0], [0], [1], [0, 0, 1, 1], [], []>} : vector<8x17xf32>, vector<17x32xf32>, vector<8x32xf32> -> vector<8x32xf32>
    %c0_3 = arith.constant 0 : index
    %c0_4 = arith.constant 0 : index
    %3 = vector.load %arg3[%c0_3, %c0_4] : memref<1x32xf32, #tpu.memory_space<vmem>>, vector<1x32xf32>
    %4 = vector.broadcast %3 : vector<1x32xf32> to vector<8x32xf32>
    %5 = arith.addf %2, %4 : vector<8x32xf32>
    %cst_5 = arith.constant 0.000000e+00 : f32
    %6 = vector.broadcast %cst_5 : f32 to vector<8x32xf32>
    %7 = arith.maximumf %5, %6 : vector<8x32xf32>
    %c0_6 = arith.constant 0 : index
    %c0_7 = arith.constant 0 : index
    %8 = vector.load %arg4[%c0_6, %c0_7] : memref<32x32xf32, #tpu.memory_space<vmem>>, vector<32x32xf32>
    %cst_8 = arith.constant dense<0.000000e+00> : vector<8x32xf32>
    %9 = tpu.matmul %7, %8, %cst_8 {dimension_numbers = #tpu.dot_dimension_numbers<[1], [0], [0], [1], [0, 0, 1, 1], [], []>} : vector<8x32xf32>, vector<32x32xf32>, vector<8x32xf32> -> vector<8x32xf32>
    %c0_9 = arith.constant 0 : index
    %c0_10 = arith.constant 0 : index
    %10 = vector.load %arg5[%c0_9, %c0_10] : memref<1x32xf32, #tpu.memory_space<vmem>>, vector<1x32xf32>
    %11 = vector.broadcast %10 : vector<1x32xf32> to vector<8x32xf32>
    %12 = arith.addf %9, %11 : vector<8x32xf32>
    %cst_11 = arith.constant 0.000000e+00 : f32
    %13 = vector.broadcast %cst_11 : f32 to vector<8x32xf32>
    %14 = arith.maximumf %12, %13 : vector<8x32xf32>
    %c0_12 = arith.constant 0 : index
    %c0_13 = arith.constant 0 : index
    %15 = vector.load %arg6[%c0_12, %c0_13] : memref<32x16xf32, #tpu.memory_space<vmem>>, vector<32x16xf32>
    %cst_14 = arith.constant dense<0.000000e+00> : vector<8x16xf32>
    %16 = tpu.matmul %14, %15, %cst_14 {dimension_numbers = #tpu.dot_dimension_numbers<[1], [0], [0], [1], [0, 0, 1, 1], [], []>} : vector<8x32xf32>, vector<32x16xf32>, vector<8x16xf32> -> vector<8x16xf32>
    %c0_15 = arith.constant 0 : index
    %c0_16 = arith.constant 0 : index
    %17 = vector.load %arg7[%c0_15, %c0_16] : memref<1x16xf32, #tpu.memory_space<vmem>>, vector<1x16xf32>
    %18 = vector.broadcast %17 : vector<1x16xf32> to vector<8x16xf32>
    %19 = arith.addf %16, %18 : vector<8x16xf32>
    %c0_17 = arith.constant 0 : index
    %c0_18 = arith.constant 0 : index
    %20 = vector.load %arg8[%c0_17, %c0_18] : memref<8x16xf32, #tpu.memory_space<vmem>>, vector<8x16xf32>
    tpu.vector_store %arg8[%c0_17, %c0_18], %19 {strides = array<i32>} : memref<8x16xf32, #tpu.memory_space<vmem>>, vector<8x16xf32>,
    return
  }
  func.func @transform_0(%arg0: i32) -> (i32, i32) {
    %c0_i32 = arith.constant 0 : i32
    %c0_i32_0 = arith.constant 0 : i32
    return %arg0, %c0_i32 : i32, i32
  }
  func.func @transform_1(%arg0: i32) -> (i32, i32) {
    %c0_i32 = arith.constant 0 : i32
    %c0_i32_0 = arith.constant 0 : i32
    %c0_i32_1 = arith.constant 0 : i32
    return %c0_i32, %c0_i32_0 : i32, i32
  }
  func.func @transform_2(%arg0: i32) -> (i32, i32) {
    %c0_i32 = arith.constant 0 : i32
    %c0_i32_0 = arith.constant 0 : i32
    %c0_i32_1 = arith.constant 0 : i32
    return %c0_i32, %c0_i32_0 : i32, i32
  }
  func.func @transform_3(%arg0: i32) -> (i32, i32) {
    %c0_i32 = arith.constant 0 : i32
    %c0_i32_0 = arith.constant 0 : i32
    %c0_i32_1 = arith.constant 0 : i32
    return %c0_i32, %c0_i32_0 : i32, i32
  }
  func.func @transform_4(%arg0: i32) -> (i32, i32) {
    %c0_i32 = arith.constant 0 : i32
    %c0_i32_0 = arith.constant 0 : i32
    %c0_i32_1 = arith.constant 0 : i32
    return %c0_i32, %c0_i32_0 : i32, i32
  }
  func.func @transform_5(%arg0: i32) -> (i32, i32) {
    %c0_i32 = arith.constant 0 : i32
    %c0_i32_0 = arith.constant 0 : i32
    %c0_i32_1 = arith.constant 0 : i32
    return %c0_i32, %c0_i32_0 : i32, i32
  }
  func.func @transform_6(%arg0: i32) -> (i32, i32) {
    %c0_i32 = arith.constant 0 : i32
    %c0_i32_0 = arith.constant 0 : i32
    %c0_i32_1 = arith.constant 0 : i32
    return %c0_i32, %c0_i32_0 : i32, i32
  }
  func.func @transform_7(%arg0: i32) -> (i32, i32) {
    %c0_i32 = arith.constant 0 : i32
    %c0_i32_0 = arith.constant 0 : i32
    return %arg0, %c0_i32 : i32, i32
  }
}

</mosaic_0001>

<bundles_post_ra>
// kernel: gflownet_ising_init_forward.1
= control target key start
LH: loop header
LB: loop body
LE: loop exit
PB: predicated region body
PF: predicated region fallthrough
CT: control target
= control target key end

     0   :  { %12 = vsyncpa [#allocation3], 0  ;;  %s312_s0 = inlined_call_operand.vmem [shape: f32[8,17], index: 0, kind: input, shape index: {}]   ;;  %s313_s1 = inlined_call_operand.hbm [shape: f32[17,32], index: 1, kind: input, shape index: {}]   ;;  %s314_s2 = inlined_call_operand.vmem [shape: f32[1,32], index: 2, kind: input, shape index: {}]   ;;  %s315_s3 = inlined_call_operand.vmem [shape: f32[32,32], index: 3, kind: input, shape index: {}]   ;;  %s316_s4 = inlined_call_operand.vmem [shape: f32[1,32], index: 4, kind: input, shape index: {}]   ;;  %s317_s5 = inlined_call_operand.vmem [shape: f32[32,16], index: 5, kind: input, shape index: {}]   ;;  %s318_s6 = inlined_call_operand.vmem [shape: f32[1,16], index: 6, kind: input, shape index: {}]   ;;  %s319_s7 = inlined_call_operand.hbm [shape: f32[8,16], index: 7, kind: output, shape index: {}]  }
   0x1   :  { %13 = vsyncpa [#allocation4], 0  ;;  %s20_s26 = sshll.u32 %s313_s1, 4  ;;  %s226_s27 = smov [#allocation2]   ;;  %s21_s26 = int_to_ptr.hbm [resolvable:$true] %s20_s26 }
   0x2   :  { %s22_s28 = sshll.u32 %s226_s27, 4  ;;  %s227_s29 = smov 128   ;;  %s23_s28 = int_to_ptr.vmem [resolvable:$true] %s22_s28 }
   0x3   :  { %s228_s30 = smov 8  }
   0x4   :  { %28 = dma.hbm_to_vmem [thread:$0]  %s21_s26, 384, %s23_s28, [#allocation3], %s227_s29, %s227_s29, %s228_s30  }
   0x5   :  { %222 = dma.done.wait [#allocation3], 384  }
   0x6   :  { %223 = vsyncadd [#allocation3], 4294966912  ;;  %vm55_vm0 = vcmask 1040384   ;;  %v46_v0 = vld [vmem:[#allocation2 + $0x10] sm:$0x1]  ;;  %v45_v1 = vld [vmem:[#allocation2 + $0x8] sm:$0xff] }
   0x7   :  { %163 = vmatpush.msk.msra.mxu0 %vm55_vm0, %v46_v0  ;;  %v83_v2 = vld [vmem:[%s315_s3 + $0x18] sm:$0xff]  ;;  %v44_v3 = vld [vmem:[#allocation2] sm:$0xff]  ;;  %vm51_vm1 = vcmask 138240   ;;  %v82_v5 = vld [vmem:[%s315_s3 + $0x10] sm:$0xff]  ;;  %vm88_vm2 = vcmask 261120   ;;  %s229_s28 = smov [#allocation5]  }
   0x8   :  { %104 = vmatpush.msra.mxu1 %v83_v2  ;;  %v43_v4 = vld [vmem:[%s312_s0] sm:$0xff]  ;;  %v81_v6 = vld [vmem:[%s315_s3 + $0x8] sm:$0xff]  ;;  %v116_v8 = vld [vmem:[%s317_s5 + $0x18] sm:$0xff]  ;;  %s151_s29 = sshll.u32 %s229_s28, 4  ;;  %s153_s9 = sshll.u32 %s319_s7, 4  ;;  %vm144_vm3 = vcmask 130048   ;;  %s152_s29 = int_to_ptr.vmem [resolvable:$true] %s151_s29  ;;  %s154_s9 = int_to_ptr.hbm [resolvable:$true] %s153_s9 }
   0x9   :  { %73 = vmatpush.msra.mxu0 %v45_v1  ;;  %v80_v7 = vld [vmem:[%s315_s3] sm:$0xff]  ;;  %136 = vmatpush.msra.mxu2 %v116_v8  ;;  %v115_v13 = vld [vmem:[%s317_s5 + $0x10] sm:$0xff]  ;;  %v114_v14 = vld [vmem:[%s317_s5 + $0x8] sm:$0xff] }
   0xa   :  { %105 = vmatpush.msra.mxu1 %v82_v5  ;;  %v171_v9 = vld [vmem:[%s314_s2] ss:$0 sm:$0xff] }
   0xb   :  { %74 = vmatpush.msra.mxu0 %v44_v3  ;;  %137 = vmatpush.msra.mxu2 %v115_v13  ;;  %v113_v15 = vld [vmem:[%s317_s5] sm:$0xff] }
   0xc   :  { %164 = vmatmul.msk.f32.vlgmr.msra.gmra.mxu0 %vm51_vm1, %v43_v4  ;;  %106 = vmatpush.msra.mxu1 %v81_v6  ;;  %v172_v16 = vld [vmem:[%s316_s4] ss:$0 sm:$0xff] }
   0xd   :  { %138 = vmatpush.msra.mxu2 %v114_v14  ;;  %v173_v20 = vld [vmem:[%s318_s6] ss:$0 sm:$0xff] }
   0xe   :  { %107 = vmatpush.msra.mxu1 %v80_v7 }
   0xf   :  { %139 = vmatpush.msra.mxu2 %v113_v15 }
  0x89   :  { %v76_v10 = vpop.f32.mrf.mxu0 }
  0x8a   :  { %v77_v11 = vadd.f32 %v171_v9, %v76_v10 }
  0x8c   :  { %v79_v12 = vmax.f32 %v77_v11, 0.0 }
  0x8e   :  { %165 = vmatmul.msk.f32.vlgmr.msra.gmra.mxu1 %vm88_vm2, %v79_v12 }
 0x10b   :  { %v109_v17 = vpop.f32.mrf.mxu1 }
 0x10c   :  { %v110_v18 = vadd.f32 %v172_v16, %v109_v17 }
 0x10e   :  { %v112_v19 = vmax.f32 %v110_v18, 0.0 }
 0x110   :  { %166 = vmatmul.msk.f32.vlgmr.msra.gmra.mxu2 %vm88_vm2, %v112_v19 }
 0x193   :  { %v141_v21 = vpop.f32.mrf.mxu2 }
 0x194   :  { %v142_v22 = vadd.f32 %v173_v20, %v141_v21 }
 0x196   :  { %145 = vst.msk [vmem:[#allocation5] sm:$0xff] %vm144_vm3, %v142_v22 }
 0x197   :  { %156 = dma.vmem_to_hbm [thread:$0]  %s152_s29, 128, %s154_s9, [#allocation4]  }
 0x198   :  { %224 = dma.done.wait [#allocation4], 128  }
 0x199   :  { %225 = vsyncadd [#allocation4], 4294967168 }
 0x19a   :  { %161 = vsyncpa [#allocation3], 1 }
 0x19b   :  { %162 = vsyncpa [#allocation4], 1 }

</bundles_post_ra>
